<compile_context>
chip_gen: v6e
topology: v6e:2x2x1
jax: 0.10.0
libtpu: 0.0.40
codegen_flags: <defaults>
</compile_context>

<pallas_src>
import jax
import jax.numpy as jnp
import numpy as np
from jax.experimental import pallas as pl
from jax.experimental.pallas import tpu as pltpu

_EPS = 1e-5


# ----------------------------------------------------------------------------
# Helpers
# ----------------------------------------------------------------------------
def _fold_bn(gamma, beta, mean, var):
    inv = gamma * jax.lax.rsqrt(var + _EPS)
    scale = inv.reshape(1, 1, 1, -1).astype(jnp.float32)
    shift = (beta - mean * inv).reshape(1, 1, 1, -1).astype(jnp.float32)
    return scale, shift


def _cout_tile(cout):
    # Lane-dense output tiles for production channel counts; whole Cout otherwise.
    for t in (256, 128):
        if cout % t == 0:
            return t
    return cout


def _compiler_params(block_bytes, scratch_bytes, semantics):
    # Rough VMEM budget: double-buffered blocks + scratch, 2x headroom,
    # clamped to stay under v7x's 64 MiB physical VMEM.
    est = 2 * block_bytes + scratch_bytes
    limit = int(min(48 << 20, max(32 << 20, 2 * est)))
    return pltpu.CompilerParams(dimension_semantics=semantics,
                                vmem_limit_bytes=limit)


# ----------------------------------------------------------------------------
# Kernels
# ----------------------------------------------------------------------------
def _make_fused_conv3x3_kernel(H, W, Ho, Wo, Cin, TCout, stride, residual_mode,
                               compute_dtype):
    """relu(x*scale+shift) -> 3x3 'same' conv (stride) [-> + residual] for one image."""

    def hsl(d):
        return slice(d, d + Ho) if stride == 1 else pl.ds(d, Ho, stride=stride)

    def wsl(d):
        return slice(d, d + Wo) if stride == 1 else pl.ds(d, Wo, stride=stride)

    def kernel(*refs):
        if residual_mode == "none":
            x_ref, scale_ref, shift_ref, w_ref, o_ref, xs_ref = refs
        elif residual_mode == "raw":
            x_ref, scale_ref, shift_ref, w_ref, r_ref, o_ref, xs_ref = refs
        else:  # "bnrelu": residual itself gets relu(r*rscale+rshift) applied
            (x_ref, scale_ref, shift_ref, w_ref, r_ref, rscale_ref, rshift_ref,
             o_ref, xs_ref) = refs

        # Fill the zero-padded, BN+ReLU'd input scratch once per batch element
        # (reused across the Cout-tile grid axis).
        @pl.when(pl.program_id(1) == 0)
        def _():
            xs_ref[...] = jnp.zeros_like(xs_ref)
            xb = x_ref[0].astype(jnp.float32)                       # (H, W, Cin)
            act = jnp.maximum(xb * scale_ref[0] + shift_ref[0], 0.0)
            xs_ref[1:H + 1, 1:W + 1, :] = act

        # 9-tap MXU accumulation over only the strided output positions.
        acc = jnp.zeros((Ho * Wo, TCout), jnp.float32)
        for di in range(3):
            for dj in range(3):
                patch = xs_ref[hsl(di), wsl(dj), :]                 # (Ho, Wo, Cin)
                p2d = patch.reshape(Ho * Wo, Cin).astype(compute_dtype)
                acc = acc + jnp.dot(p2d, w_ref[di, dj],
                                    preferred_element_type=jnp.float32)

        out = acc.reshape(Ho, Wo, TCout)
        if residual_mode == "raw":
            out = out + r_ref[0].astype(jnp.float32)
        elif residual_mode == "bnrelu":
            r = r_ref[0].astype(jnp.float32)
            out = out + jnp.maximum(r * rscale_ref[0] + rshift_ref[0], 0.0)
        o_ref[...] = out.reshape(1, Ho, Wo, TCout).astype(o_ref.dtype)

    return kernel


def _make_fused_conv1x1_kernel(H, W, Ho, Wo, Cin, TCout, stride, compute_dtype):
    """relu(x*scale+shift) -> strided 1x1 conv for one image."""

    def kernel(x_ref, scale_ref, shift_ref, w_ref, o_ref):
        if stride == 1:
            xb = x_ref[...]
        else:
            xb = x_ref[:, pl.ds(0, Ho, stride=stride), pl.ds(0, Wo, stride=stride), :]
        act = jnp.maximum(xb.astype(jnp.float32) * scale_ref[...] + shift_ref[...], 0.0)
        a2d = act.reshape(Ho * Wo, Cin).astype(compute_dtype)
        y = jnp.dot(a2d, w_ref[...], preferred_element_type=jnp.float32)
        o_ref[...] = y.reshape(1, Ho, Wo, TCout).astype(o_ref.dtype)

    return kernel


# ----------------------------------------------------------------------------
# Pallas wrappers (NHWC)
# ----------------------------------------------------------------------------
def fused_bn_relu_conv3x3(x, scale, shift, w, *, stride=1, residual=None,
                          residual_bn=None, out_dtype=jnp.float32,
                          compute_dtype=jnp.bfloat16):
    """out = conv3x3(relu(x*scale+shift), w, stride, pad=1)
             [+ residual  |  + relu(residual*rs+rb)]"""
    N, H, W_, Cin = x.shape
    Cout = w.shape[-1]
    Ho = (H - 1) // stride + 1
    Wo = (W_ - 1) // stride + 1
    TCout = _cout_tile(Cout)
    JC = Cout // TCout

    if residual is None:
        mode = "none"
    elif residual_bn is None:
        mode = "raw"
    else:
        mode = "bnrelu"

    w = w.astype(compute_dtype)

    in_specs = [
        pl.BlockSpec((1, H, W_, Cin), lambda n, jc: (n, 0, 0, 0)),
        pl.BlockSpec((1, 1, 1, Cin), lambda n, jc: (0, 0, 0, 0)),
        pl.BlockSpec((1, 1, 1, Cin), lambda n, jc: (0, 0, 0, 0)),
        pl.BlockSpec((3, 3, Cin, TCout), lambda n, jc: (0, 0, 0, jc)),
    ]
    args = [x, scale, shift, w]
    if mode != "none":
        in_specs.append(pl.BlockSpec((1, Ho, Wo, TCout), lambda n, jc: (n, 0, 0, jc)))
        args.append(residual)
    if mode == "bnrelu":
        rs, rb = residual_bn
        in_specs.append(pl.BlockSpec((1, 1, 1, TCout), lambda n, jc: (0, 0, 0, jc)))
        in_specs.append(pl.BlockSpec((1, 1, 1, TCout), lambda n, jc: (0, 0, 0, jc)))
        args.extend([rs, rb])

    kernel = _make_fused_conv3x3_kernel(H, W_, Ho, Wo, Cin, TCout, stride, mode,
                                        compute_dtype)

    cdt = np.dtype(compute_dtype).itemsize
    block_bytes = (H * W_ * Cin * x.dtype.itemsize
                   + 9 * Cin * TCout * cdt
                   + Ho * Wo * TCout * np.dtype(out_dtype).itemsize
                   + (Ho * Wo * TCout * 4 if mode != "none" else 0))
    scratch_bytes = (H + 2) * (W_ + 2) * Cin * 4

    return pl.pallas_call(
        kernel,
        grid=(N, JC),
        in_specs=in_specs,
        out_specs=pl.BlockSpec((1, Ho, Wo, TCout), lambda n, jc: (n, 0, 0, jc)),
        out_shape=jax.ShapeDtypeStruct((N, Ho, Wo, Cout), out_dtype),
        scratch_shapes=[pltpu.VMEM((H + 2, W_ + 2, Cin), jnp.float32)],
        compiler_params=_compiler_params(block_bytes, scratch_bytes,
                                         ("parallel", "arbitrary")),
    )(*args)


def fused_bn_relu_conv1x1(x, scale, shift, w, *, stride=1, out_dtype=jnp.float32,
                          compute_dtype=jnp.bfloat16):
    """out = conv1x1(relu(x*scale+shift), w, stride)  (shortcut branch)."""
    N, H, W_, Cin = x.shape
    Cout = w.shape[-1]
    Ho = (H - 1) // stride + 1
    Wo = (W_ - 1) // stride + 1
    TCout = _cout_tile(Cout)
    JC = Cout // TCout

    kernel = _make_fused_conv1x1_kernel(H, W_, Ho, Wo, Cin, TCout, stride, compute_dtype)
    w = w.astype(compute_dtype)

    block_bytes = (H * W_ * Cin * x.dtype.itemsize
                   + Cin * TCout * np.dtype(compute_dtype).itemsize
                   + Ho * Wo * TCout * np.dtype(out_dtype).itemsize)

    return pl.pallas_call(
        kernel,
        grid=(N, JC),
        in_specs=[
            pl.BlockSpec((1, H, W_, Cin), lambda n, jc: (n, 0, 0, 0)),
            pl.BlockSpec((1, 1, 1, Cin), lambda n, jc: (0, 0, 0, 0)),
            pl.BlockSpec((1, 1, 1, Cin), lambda n, jc: (0, 0, 0, 0)),
            pl.BlockSpec((Cin, TCout), lambda n, jc: (0, jc)),
        ],
        out_specs=pl.BlockSpec((1, Ho, Wo, TCout), lambda n, jc: (n, 0, 0, jc)),
        out_shape=jax.ShapeDtypeStruct((N, Ho, Wo, Cout), out_dtype),
        compiler_params=_compiler_params(block_bytes, 0, ("parallel", "parallel")),
    )(x, scale, shift, w)


# ----------------------------------------------------------------------------
# PreActBlock: parameters + forward
# ----------------------------------------------------------------------------
def init_preact_block_params(key, in_planes, planes, stride):
    ks = jax.random.split(key, 9)

    def bn_params(k, c):
        k1, k2, k3, k4 = jax.random.split(k, 4)
        gamma = 1.0 + 0.1 * jax.random.normal(k1, (c,), jnp.float32)
        beta = 0.1 * jax.random.normal(k2, (c,), jnp.float32)
        mean = 0.1 * jax.random.normal(k3, (c,), jnp.float32)
        var = jax.random.uniform(k4, (c,), jnp.float32, 0.5, 1.5)
        return (gamma, beta, mean, var)

    params = {
        "bn1": bn_params(ks[0], in_planes),
        "bn2": bn_params(ks[1], planes),
    }
    # PyTorch conv weights are OIHW; convert to HWIO for the NHWC kernels.
    w1 = 0.1 * jax.random.normal(ks[2], (planes, in_planes, 3, 3), jnp.float32)
    w2 = 0.1 * jax.random.normal(ks[3], (planes, planes, 3, 3), jnp.float32)
    params["conv1_w"] = jnp.transpose(w1, (2, 3, 1, 0))
    params["conv2_w"] = jnp.transpose(w2, (2, 3, 1, 0))
    if stride != 1 or in_planes != planes:
        ws = 0.1 * jax.random.normal(ks[4], (planes, in_planes, 1, 1), jnp.float32)
        params["shortcut_w"] = jnp.transpose(ws, (2, 3, 1, 0)).reshape(in_planes, planes)
    return params


def preact_block_forward(params, x_nchw, stride, compute_dtype=jnp.bfloat16):
    """Exactly mirrors PreActBlock.forward(x, aux=False), 3 (or 2) fused pallas_calls."""
    # TODO(synk): NCHW<->NHWC boundary transposes kept only to match the PyTorch
    # module's convention; a production pipeline should keep activations NHWC end-to-end.
    x = jnp.transpose(x_nchw, (0, 2, 3, 1)).astype(jnp.float32)
    s1, b1 = _fold_bn(*params["bn1"])
    s2, b2 = _fold_bn(*params["bn2"])
    act_dtype = compute_dtype   # intermediate activation storage dtype

    if "shortcut_w" in params:
        # bn1+relu is recomputed inside both the shortcut and conv1 kernels
        # (cheap VPU work) instead of materializing relu(bn1(x)) in HBM.
        shortcut = fused_bn_relu_conv1x1(x, s1, b1, params["shortcut_w"],
                                         stride=stride, out_dtype=jnp.float32,
                                         compute_dtype=compute_dtype)
        out = fused_bn_relu_conv3x3(x, s1, b1, params["conv1_w"], stride=stride,
                                    out_dtype=act_dtype, compute_dtype=compute_dtype)
        out = fused_bn_relu_conv3x3(out, s2, b2, params["conv2_w"], stride=1,
                                    residual=shortcut, out_dtype=jnp.float32,
                                    compute_dtype=compute_dtype)
    else:
        # Identity shortcut: residual = relu(bn1(x)), recomputed inside conv2.
        out = fused_bn_relu_conv3x3(x, s1, b1, params["conv1_w"], stride=stride,
                                    out_dtype=act_dtype, compute_dtype=compute_dtype)
        out = fused_bn_relu_conv3x3(out, s2, b2, params["conv2_w"], stride=1,
                                    residual=x, residual_bn=(s1, b1),
                                    out_dtype=jnp.float32, compute_dtype=compute_dtype)
    return jnp.transpose(out, (0, 3, 1, 2))   # NHWC -> NCHW


# ----------------------------------------------------------------------------
# Pure-XLA reference (for correctness check)
# ----------------------------------------------------------------------------
def _conv_ref(x, w, stride, pad, compute_dtype):
    return jax.lax.conv_general_dilated(
        x.astype(compute_dtype), w.astype(compute_dtype),
        window_strides=(stride, stride),
        padding=((pad, pad), (pad, pad)),
        dimension_numbers=("NHWC", "HWIO", "NHWC"),
        preferred_element_type=jnp.float32)


def reference_forward(params, x_nchw, stride, compute_dtype=jnp.float32):
    x = jnp.transpose(x_nchw, (0, 2, 3, 1)).astype(jnp.float32)

    def bnrelu(v, p):
        gamma, beta, mean, var = p
        return jax.nn.relu((v - mean) / jnp.sqrt(var + _EPS) * gamma + beta)

    out1 = bnrelu(x, params["bn1"])
    if "shortcut_w" in params:
        w = params["shortcut_w"].reshape(1, 1, *params["shortcut_w"].shape)
        shortcut = _conv_ref(out1, w, stride, 0, compute_dtype)
    else:
        shortcut = out1
    out = _conv_ref(out1, params["conv1_w"], stride, 1, compute_dtype)
    out = bnrelu(out, params["bn2"])
    out = _conv_ref(out, params["conv2_w"], 1, 1, compute_dtype) + shortcut
    return jnp.transpose(out, (0, 3, 1, 2))


# ----------------------------------------------------------------------------
if __name__ == "__main__":
    key = jax.random.PRNGKey(0)
    kx, kp = jax.random.split(key)

    in_planes, planes, stride = 4, 8, 2
    N, H, W = 2, 16, 16

    x = jax.random.normal(kx, (N, in_planes, H, W), jnp.float32)
    params = init_preact_block_params(kp, in_planes, planes, stride)

    # fp32 compute path (tight check against fp32 XLA reference)
    y32 = jax.block_until_ready(
        preact_block_forward(params, x, stride, compute_dtype=jnp.float32))
    assert y32.shape == (N, planes, H // stride, W // stride), y32.shape
    ref32 = jax.block_until_ready(
        reference_forward(params, x, stride, compute_dtype=jnp.float32))
    np.testing.assert_allclose(np.asarray(y32), np.asarray(ref32), rtol=1e-3, atol=1e-3)

    # bf16 MXU path (default perf mode; checked against bf16-cast reference)
    ybf = jax.block_until_ready(
        preact_block_forward(params, x, stride, compute_dtype=jnp.bfloat16))
    refbf = jax.block_until_ready(
        reference_forward(params, x, stride, compute_dtype=jnp.bfloat16))
    np.testing.assert_allclose(np.asarray(ybf), np.asarray(refbf), rtol=5e-2, atol=5e-2)

    # identity-shortcut path (stride=1, in_planes == planes): exercises fused
    # bn1+relu residual recompute inside the conv2 kernel.
    params_id = init_preact_block_params(kp, planes, planes, 1)
    x_id = jax.random.normal(kx, (N, planes, H, W), jnp.float32)
    y_id = jax.block_until_ready(
        preact_block_forward(params_id, x_id, 1, compute_dtype=jnp.float32))
    ref_id = jax.block_until_ready(
        reference_forward(params_id, x_id, 1, compute_dtype=jnp.float32))
    np.testing.assert_allclose(np.asarray(y_id), np.asarray(ref_id), rtol=1e-3, atol=1e-3)

    print("KERNEL_OK")
</pallas_src>

<mosaic_0001>
module attributes {stable_mosaic.version = 11 : i64} {
  func.func @kernel(%arg0: i32, %arg1: i32, %arg2: memref<1x16x16x4xf32, #tpu.memory_space<vmem>>, %arg3: memref<1x1x1x4xf32, #tpu.memory_space<vmem>>, %arg4: memref<1x1x1x4xf32, #tpu.memory_space<vmem>>, %arg5: memref<4x8xf32, #tpu.memory_space<vmem>>, %arg6: memref<1x8x8x8xf32, #tpu.memory_space<vmem>>) attributes {dimension_semantics = [#tpu.dimension_semantics<parallel>, #tpu.dimension_semantics<parallel>], iteration_bounds = array<i64: 2, 1>, scalar_prefetch = 0 : i64, scratch_operands = 0 : i64, tpu.core_type = #tpu.core_type<tc>, window_params = [{transform_indices = @transform_0, window_bounds = array<i64: 1, 16, 16, 4>}, {pipeline_mode = #tpu.pipeline_mode<synchronous>, transform_indices = @transform_1, window_bounds = array<i64: 1, 1, 1, 4>}, {pipeline_mode = #tpu.pipeline_mode<synchronous>, transform_indices = @transform_2, window_bounds = array<i64: 1, 1, 1, 4>}, {transform_indices = @transform_3, window_bounds = array<i64: 4, 8>}, {transform_indices = @transform_4, window_bounds = array<i64: 1, 8, 8, 8>}]} {
    %c0 = arith.constant 0 : index
    %c0_0 = arith.constant 0 : index
    %c0_1 = arith.constant 0 : index
    %c0_2 = arith.constant 0 : index
    %0 = tpu.strided_load %arg2[%c0, %c0_0, %c0_1, %c0_2] {strides = array<i32: 1, 2, 2, 1>} : memref<1x16x16x4xf32, #tpu.memory_space<vmem>>, vector<1x8x8x4xf32>
    %c0_3 = arith.constant 0 : index
    %c0_4 = arith.constant 0 : index
    %c0_5 = arith.constant 0 : index
    %c0_6 = arith.constant 0 : index
    %1 = vector.load %arg3[%c0_3, %c0_4, %c0_5, %c0_6] : memref<1x1x1x4xf32, #tpu.memory_space<vmem>>, vector<1x1x1x4xf32>
    %2 = vector.broadcast %1 : vector<1x1x1x4xf32> to vector<1x8x8x4xf32>
    %3 = arith.mulf %0, %2 : vector<1x8x8x4xf32>
    %c0_7 = arith.constant 0 : index
    %c0_8 = arith.constant 0 : index
    %c0_9 = arith.constant 0 : index
    %c0_10 = arith.constant 0 : index
    %4 = vector.load %arg4[%c0_7, %c0_8, %c0_9, %c0_10] : memref<1x1x1x4xf32, #tpu.memory_space<vmem>>, vector<1x1x1x4xf32>
    %5 = vector.broadcast %4 : vector<1x1x1x4xf32> to vector<1x8x8x4xf32>
    %6 = arith.addf %3, %5 : vector<1x8x8x4xf32>
    %cst = arith.constant 0.000000e+00 : f32
    %7 = vector.broadcast %cst : f32 to vector<1x8x8x4xf32>
    %8 = arith.maximumf %6, %7 : vector<1x8x8x4xf32>
    %9 = vector.shape_cast %8 : vector<1x8x8x4xf32> to vector<64x4xf32>
    %c0_11 = arith.constant 0 : index
    %c0_12 = arith.constant 0 : index
    %10 = vector.load %arg5[%c0_11, %c0_12] : memref<4x8xf32, #tpu.memory_space<vmem>>, vector<4x8xf32>
    %cst_13 = arith.constant dense<0.000000e+00> : vector<64x8xf32>
    %11 = tpu.matmul %9, %10, %cst_13 {dimension_numbers = #tpu.dot_dimension_numbers<[1], [0], [0], [1], [0, 0, 1, 1], [], []>} : vector<64x4xf32>, vector<4x8xf32>, vector<64x8xf32> -> vector<64x8xf32>
    %12 = vector.shape_cast %11 : vector<64x8xf32> to vector<1x8x8x8xf32>
    %c0_14 = arith.constant 0 : index
    %c0_15 = arith.constant 0 : index
    %c0_16 = arith.constant 0 : index
    %c0_17 = arith.constant 0 : index
    %13 = vector.load %arg6[%c0_14, %c0_15, %c0_16, %c0_17] : memref<1x8x8x8xf32, #tpu.memory_space<vmem>>, vector<1x8x8x8xf32>
    tpu.vector_store %arg6[%c0_14, %c0_15, %c0_16, %c0_17], %12 {strides = array<i32>} : memref<1x8x8x8xf32, #tpu.memory_space<vmem>>, vector<1x8x8x8xf32>,
    return
  }
  func.func @transform_0(%arg0: i32, %arg1: i32) -> (i32, i32, i32, i32) {
    %c0_i32 = arith.constant 0 : i32
    %c0_i32_0 = arith.constant 0 : i32
    %c0_i32_1 = arith.constant 0 : i32
    %c0_i32_2 = arith.constant 0 : i32
    return %arg0, %c0_i32, %c0_i32_0, %c0_i32_1 : i32, i32, i32, i32
  }
  func.func @transform_1(%arg0: i32, %arg1: i32) -> (i32, i32, i32, i32) {
    %c0_i32 = arith.constant 0 : i32
    %c0_i32_0 = arith.constant 0 : i32
    %c0_i32_1 = arith.constant 0 : i32
    %c0_i32_2 = arith.constant 0 : i32
    %c0_i32_3 = arith.constant 0 : i32
    return %c0_i32, %c0_i32_0, %c0_i32_1, %c0_i32_2 : i32, i32, i32, i32
  }
  func.func @transform_2(%arg0: i32, %arg1: i32) -> (i32, i32, i32, i32) {
    %c0_i32 = arith.constant 0 : i32
    %c0_i32_0 = arith.constant 0 : i32
    %c0_i32_1 = arith.constant 0 : i32
    %c0_i32_2 = arith.constant 0 : i32
    %c0_i32_3 = arith.constant 0 : i32
    return %c0_i32, %c0_i32_0, %c0_i32_1, %c0_i32_2 : i32, i32, i32, i32
  }
  func.func @transform_3(%arg0: i32, %arg1: i32) -> (i32, i32) {
    %c0_i32 = arith.constant 0 : i32
    %c0_i32_0 = arith.constant 0 : i32
    return %c0_i32, %arg1 : i32, i32
  }
  func.func @transform_4(%arg0: i32, %arg1: i32) -> (i32, i32, i32, i32) {
    %c0_i32 = arith.constant 0 : i32
    %c0_i32_0 = arith.constant 0 : i32
    %c0_i32_1 = arith.constant 0 : i32
    return %arg0, %c0_i32, %c0_i32_0, %arg1 : i32, i32, i32, i32
  }
}

</mosaic_0001>

<bundles_post_ra>
// kernel: tpu_custom_call.1
= control target key start
LH: loop header
LB: loop body
LE: loop exit
PB: predicated region body
PF: predicated region fallthrough
CT: control target
= control target key end

     0   :  { %9 = vsyncpa [#allocation3], 0  ;;  %s887_s0 = inlined_call_operand.vmem [shape: f32[2,16,16,4], index: 0, kind: input, shape index: {}]   ;;  %s888_s1 = inlined_call_operand.vmem [shape: f32[1,1,1,4], index: 1, kind: input, shape index: {}]   ;;  %s889_s2 = inlined_call_operand.vmem [shape: f32[1,1,1,4], index: 2, kind: input, shape index: {}]   ;;  %s890_s3 = inlined_call_operand.vmem [shape: f32[4,8], index: 3, kind: input, shape index: {}]   ;;  %s891_s4 = inlined_call_operand.hbm [shape: f32[2,8,8,8], index: 4, kind: output, shape index: {}]  }
   0x1   :  { %11 = vsyncpa [#allocation3 + $0x1], 0  ;;  %s748_s15 = smov 0   ;;  %s750_s16 = smov 0  }
   0x2   :  { %s752_s17 = smov 0   ;;  %s754_s18 = smov 0  }
   0x3   :  { %s756_s19 = smov 0   ;;  %s758_s20 = smov 0  }
   0x4 LB: > { %s526_s21 = sadd.s32 4294967295, %s718_s20   ;;  %s527_s22 = sadd.s32 4294967294, %s718_s20   ;;  %s718_s20 = sphi %s758_s20, %s17_s20   ;;  %s714_s19 = sphi %s756_s19, %s898_s19   ;;  %s710_s18 = sphi %s754_s18, %s897_s18   ;;  %s706_s17 = sphi %s752_s17, %s896_s17   ;;  %s702_s16 = sphi %s750_s16, %s895_s16   ;;  %s698_s15 = sphi %s748_s15, %s894_s15  }
   0x5   : > { %s29_s23 = sadd.s32 1, %s714_s19  ;;  %s132_s24 = sadd.s32 1, %s706_s17 }
   0x6   : > { %p31_p0 = scmp.ge.s32.totalorder %s29_s23, 2  ;;  %p142_p1 = scmp.ne.s32.totalorder %s706_s17, %s702_s16 }
   0x7   : > { %p143_p2 = scmp.eq.s32.totalorder %s526_s21, 1  ;;  %p148_p3 = scmp.ne.s32.totalorder %s702_s16, %s698_s15 }
   0x8   : > { %s900_s23 = smov (%p31_p0, %s29_s23), 0  ;;  %p149_p5 = scmp.eq.s32.totalorder %s527_s22, 1 }
   0x9   : > { %p788_p4 = por %p143_p2, %p142_p1  ;;  %s127_s26 = ssub.s32 %s714_s19, %s900_s23 }
   0xa   : > { %p531_p6 = scmp.ge.s32.totalorder %s718_s20, 1  ;;  %p130_p7 = scmp.eq.s32.totalorder %s127_s26, 0 }
   0xb   : > { %p795_p8 = por %p149_p5, %p148_p3  ;;  %p188_p9 = scmp.lt.s32.totalorder %s718_s20, 3 }
   0xc   : > { %s801_s28 = scalar_select %p130_p7, %s706_s17, %s132_s24  }
   0xd   : > { %p189_p10 = pnand %p531_p6, %p188_p9 }
   0xe   : > { %p218_p11 = scmp.lt.s32.totalorder (!%p189_p10), %s710_s18, 1  ;;  %s215_s14 = sand.u32 (!%p189_p10), 1, %s702_s16  }
   0xf   : > { %192 = sbr.rel (%p189_p10) target bundleno = 247 (0xf7), region = 36  ;;  %s532_s21 = sshll.u32 (!%p189_p10), %s215_s14, 6 }
  0x10   : > { %s217_s22 = scalar_lea.vmem (!%p189_p10), [#allocation2], %s532_s21  ;;  %s559_s24 = sshll.u32 (!%p189_p10), %s710_s18, 10 }
  0x11   : > { %s439_s26 = sshll.u32 (!%p189_p10), %s217_s22, 4  ;;  %s720_s7 = smov (!%p189_p10), [#allocation2]   ;;  %s836_s26 = int_to_ptr.vmem [resolvable:$true] %s439_s26 }
  0x12   : > { %s646_s8 = sshll.u32 (!%p189_p10), %s720_s7, 4  ;;  %s647_s8 = int_to_ptr.vmem [resolvable:$false] %s646_s8 }
  0x13   : > { %s648_s9 = scalar_lea.vmem (!%p189_p10), %s647_s8, 2048  ;;  %p649_p1 = scmp.lt.s32.totalorder (!%p189_p10), %s836_s26, %s647_s8 }
  0x14   : > { %v280_v0 = vld [vmem:[%s890_s3] sm:$0xf]  ;;  %vm306_vm0 = vcmask 1043456   ;;  %s219_s5 = scalar_select %p218_p11, %s710_s18, 1  ;;  %vm281_vm1 = vcmask 31744   ;;  %vm415_vm2 = vcmask 64512  }
  0x15   : > { %569 = vmatprep.subr.msk.mxu0 %vm306_vm0, %v280_v0  ;;  %583 = vmatprep.subr.msk.mxu1 %vm306_vm0, %v280_v0  ;;  %v542_v1 = vld [vmem:[%s888_s1] ss:$0 sm:$0xff]  ;;  %s842_s18 = scalar_lea.sflag [#allocation3], %s215_s14 }
  0x16   : > { %570 = vmatpush3.msk.msra.mxu0 %vm306_vm0, %v280_v0  ;;  %584 = vmatpush3.msk.msra.mxu1 %vm306_vm0, %v280_v0  ;;  %s558_s6 = sshll.u32 %s219_s5, 8  ;;  %v543_v2 = vld [vmem:[%s889_s2] ss:$0 sm:$0xff]  ;;  %s834_s5 = scalar_lea.hbm %s891_s4, %s559_s24 }
  0x17   : > { %s222_s11 = scalar_lea.vmem %s887_s0, %s558_s6  ;;  %s642_s6 = scalar_lea.vmem %s836_s26, 1024 }
  0x18   : > { %v227_v3 = vld [vmem:[%s222_s11] ss:$2 sm:$0xff]  ;;  %p643_p12 = scmp.ne.s32.totalorder %s836_s26, %s642_s6  ;;  %p650_p2 = scmp.lt.s32.totalorder %s648_s9, %s642_s6 }
  0x19   : > { %v538_v4 = vld [vmem:[%s222_s11 + $0x80] ss:$2 sm:$0xff]  ;;  %v249_v6 = vmul.f32 %v542_v1, %v227_v3 }
  0x1a   : > { %v535_v5 = vld [vmem:[%s222_s11 + $0x20] ss:$2 sm:$0xff]  ;;  %v253_v7 = vmul.f32 %v542_v1, %v538_v4  ;;  %p644_p13 = pnand %p643_p12, %p788_p4  ;;  %p651_p3 = por %p650_p2, %p649_p1 }
  0x1b   : > { %v250_v8 = vmul.f32 %v542_v1, %v535_v5  ;;  %v539_v9 = vld [vmem:[%s222_s11 + $0xa0] ss:$2 sm:$0xff]  ;;  %v264_v17 = vadd.f32 %v543_v2, %v249_v6 }
  0x1c   : > { %v536_v10 = vld [vmem:[%s222_s11 + $0x40] ss:$2 sm:$0xff]  ;;  %v254_v12 = vmul.f32 %v542_v1, %v539_v9  ;;  %v268_v18 = vadd.f32 %v543_v2, %v253_v7  ;;  %p645_p0 = pneg %p644_p13 }
  0x1d   : > { %v540_v11 = vld [vmem:[%s222_s11 + $0xc0] ss:$2 sm:$0xff]  ;;  %v251_v13 = vmul.f32 %v542_v1, %v536_v10  ;;  %v265_v19 = vadd.f32 %v543_v2, %v250_v8  ;;  %v272_v25 = vmax.f32 %v264_v17, 0.0 }
  0x1e   : > { %v255_v14 = vmul.f32 %v542_v1, %v540_v11  ;;  %v537_v15 = vld [vmem:[%s222_s11 + $0x60] ss:$2 sm:$0xff]  ;;  %v269_v21 = vadd.f32 %v543_v2, %v254_v12  ;;  %v276_v26 = vmax.f32 %v268_v18, 0.0  ;;  %p652_p5 = pnand %p651_p3, %p645_p0 }
  0x1f   : > { %v541_v16 = vld [vmem:[%s222_s11 + $0xe0] ss:$2 sm:$0xff]  ;;  %v252_v20 = vmul.f32 %v542_v1, %v537_v15  ;;  %v266_v22 = vadd.f32 %v543_v2, %v251_v13  ;;  %v273_v27 = vmax.f32 %v265_v19, 0.0  ;;  %571 = vmatprep.mubr.msk.f32.mxu0 %vm281_vm1, %v272_v25 }
  0x20   : > { %v270_v23 = vadd.f32 %v543_v2, %v255_v14  ;;  %v256_v24 = vmul.f32 %v542_v1, %v541_v16  ;;  %v277_v29 = vmax.f32 %v269_v21, 0.0  ;;  %577 = vmatprep.mubr.msk.f32.mxu1 %vm281_vm1, %v276_v26 }
  0x21   : > { %v267_v28 = vadd.f32 %v543_v2, %v252_v20  ;;  %v274_v30 = vmax.f32 %v266_v22, 0.0  ;;  %572 = vmatmul.mubr.msk.f32.vlgmr.msra.gmra.mxu0 %vm281_vm1, %v273_v27 }
  0x22   : > { %v278_v31 = vmax.f32 %v270_v23, 0.0  ;;  %v271_v32 = vadd.f32 %v543_v2, %v256_v24  ;;  %578 = vmatmul.mubr.msk.f32.vlgmr.msra.gmra.mxu1 %vm281_vm1, %v277_v29 }
  0x23   : > { %v275_v33 = vmax.f32 %v267_v28, 0.0  ;;  %574 = vmatprep.mubr.msk.f32.mxu0 %vm281_vm1, %v274_v30 }
  0x24   : > { %v279_v34 = vmax.f32 %v271_v32, 0.0  ;;  %580 = vmatprep.mubr.msk.f32.mxu1 %vm281_vm1, %v278_v31 }
  0x25   : > { %575 = vmatmul.mubr.msk.f32.gmra.mxu0 %vm281_vm1, %v275_v33 }
  0x26   : > { %581 = vmatmul.mubr.msk.f32.gmra.mxu1 %vm281_vm1, %v279_v34 }
  0xe1   : > { %v573_v35 = vpop.f32.mrf.mxu0 }
  0xe2   : > { %v579_v36 = vpop.f32.mrf.mxu1  ;;  %417 = vst.msk [vmem:[%s217_s22 + $0x8] sm:$0xff] %vm415_vm2, %v573_v35 }
  0xe3   : > { %421 = vst.msk [vmem:[%s217_s22 + $0x28] sm:$0xff] %vm415_vm2, %v579_v36  ;;  %v376_v37 = vpop.f32.mrf.mxu0 }
  0xe4   : > { %v396_v38 = vpop.f32.mrf.mxu1  ;;  %416 = vst.msk [vmem:[%s217_s22] sm:$0xff] %vm415_vm2, %v376_v37 }
  0xe5   : > { %420 = vst.msk [vmem:[%s217_s22 + $0x20] sm:$0xff] %vm415_vm2, %v396_v38  ;;  %v576_v39 = vpop.f32.mrf.mxu0 }
  0xe6   : > { %v582_v40 = vpop.f32.mrf.mxu1  ;;  %419 = vst.msk [vmem:[%s217_s22 + $0x18] sm:$0xff] %vm415_vm2, %v576_v39 }
  0xe7   : > { %423 = vst.msk [vmem:[%s217_s22 + $0x38] sm:$0xff] %vm415_vm2, %v582_v40  ;;  %v386_v41 = vpop.f32.mrf.mxu0 }
  0xe8   : > { %v406_v42 = vpop.f32.mrf.mxu1  ;;  %418 = vst.msk [vmem:[%s217_s22 + $0x10] sm:$0xff] %vm415_vm2, %v386_v41 }
  0xe9   : > { %422 = vst.msk [vmem:[%s217_s22 + $0x30] sm:$0xff] %vm415_vm2, %v406_v42 }
  0xea   : > { %655 = shalt.err (!%p652_p5)
}
  0xeb   : > { %s656_s10 = scalar_lea.hbm %s834_s5, 1024  ;;  %s660_s13 = scalar_lea.hbm %s891_s4, 2048 }
  0xec   : > { %p657_p6 = scmp.ne.s32.totalorder %s834_s5, %s656_s10  ;;  %p661_p10 = scmp.lt.s32.totalorder %s834_s5, %s891_s4 }
  0xed   : > { %p662_p11 = scmp.lt.s32.totalorder %s660_s13, %s656_s10 }
  0xee   : > { %p658_p7 = pnand %p657_p6, %p788_p4 }
  0xef   : > { %p663_p12 = por %p662_p11, %p661_p10 }
  0xf0   : > { %p659_p9 = pneg %p658_p7 }
  0xf2   : > { %p664_p13 = pnand %p663_p12, %p659_p9 }
  0xf4   : > { %667 = shalt.err (!%p664_p13)
}
  0xf5   : > { %s721_s22 = smov 128   ;;  %s722_s24 = smov 8  }
  0xf6   : > { %585 = dma.vmem_to_hbm [thread:$0]  (%p788_p4), %s836_s26, 1024, %s834_s5, %s842_s18, %s721_s22, %s721_s22, %s722_s24  }
  0xf7 PF: > { %p591_p0 = scmp.ge.s32.totalorder %s718_s20, 2  ;;  %s454_s29 = sand.u32 1, %s698_s15  }
  0xf8   : > { %s455_s30 = scalar_lea.sflag [#allocation3], %s454_s29 }
  0xf9   : > { %p588_p1 = pnand %p591_p0, %p795_p8 }
  0xfb   : > { %p589_p2 = pneg %p588_p1 }
  0xfd   : > { %693 = dma.done.wait (%p589_p2), %s455_s30, 1024  }
  0xfe   : > { %695 = vsyncadd (%p589_p2), %s455_s30, 4294966272  ;;  %s17_s20 = sadd.s32 1, %s718_s20   ;;  %s894_s15 = smov %s702_s16 }
  0xff   : > { %p14_p3 = scmp.ge.s32.totalorder %s17_s20, 4   ;;  %s895_s16 = smov %s706_s17 }
 0x100   : > { %s896_s17 = smov %s801_s28  ;;  %s897_s18 = smov %s714_s19 }
 0x101   : > { %s898_s19 = smov %s900_s23  ;;  %16 = sbr.rel (!%p14_p3) target bundleno = 4 (0x4), region = 81 }
 0x106   :  { %460 = vsyncpa [#allocation3], 1 }
 0x107   :  { %462 = vsyncpa [#allocation3 + $0x1], 1 }

</bundles_post_ra>
